<compile_context>
chip_gen: v6e
topology: v6e:2x2x1
jax: 0.10.0
libtpu: 0.0.40
codegen_flags: <defaults>
</compile_context>

<pallas_src>
import math

import jax
import jax.numpy as jnp
from jax.experimental import pallas as pl
from jax.experimental.pallas import tpu as pltpu

NUM_CLASSES = 8
OUT_PAD = 128          # lane-dense output slab; real logits live in [:, :NUM_CLASSES]
IN_FEATURES = 512      # InceptionResnetV1.logits.in_features

# Backbone weight (flat_dim, 512) bf16 is kept fully VMEM-resident up to this many
# input features (2 MiB of weight).  At tb=512 the total double-buffered footprint
# (f32 activations + bf16 weights + outputs) stays ~13 MiB, inside every
# generation's budget once vmem_limit_bytes is raised explicitly.
RESIDENT_MAX_FLAT_DIM = 2048


def _round_up(x, m):
    return ((x + m - 1) // m) * m


def _vmem_bytes(shape, itemsize, nbuf=2):
    """(8,128)-tiled size of one VMEM buffer times the buffer count."""
    r, c = shape
    return _round_up(max(r, 1), 8) * _round_up(max(c, 1), 128) * itemsize * nbuf


# ----------------------------------------------------------------------------- kernels


def baseline_inc_kernel_resident(xf_ref, wbb_ref, bbb_ref, wf_ref, bf_ref, out_ref):
    """One batch tile; backbone weight fully VMEM-resident (constant index_map)."""
    x = xf_ref[...].astype(jnp.bfloat16)               # f32 streamed, cast in-register
    fea = (jnp.dot(x, wbb_ref[...], preferred_element_type=jnp.float32)
           + bbb_ref[...])
    # self.out in eval mode: Dropout = identity, no activation between the two
    # linears, so out = ReLU(fea) @ (W1@W2) + (b1@W2 + b2); fold precomputed in
    # the wrapper into wf / bf (padded to 128 lanes).
    r = jnp.maximum(fea, 0.0).astype(jnp.bfloat16)
    out_ref[...] = (jnp.dot(r, wf_ref[...], preferred_element_type=jnp.float32)
                    + bf_ref[...])


def baseline_inc_kernel_ktiled(xf_ref, wbb_ref, bbb_ref, wf_ref, bf_ref,
                               out_ref, acc_ref):
    """(batch-tile, K-tile) grid step for large flat_dim.

    grid = (B_pad // tb, K_pad // tk); K is the trailing 'arbitrary' axis.
    acc_ref (tb, 512) f32 persists across K steps and holds the backbone feature.
    """
    k = pl.program_id(1)

    @pl.when(k == 0)
    def _():
        # Fold the backbone bias into the accumulator init.
        acc_ref[...] = jnp.broadcast_to(bbb_ref[...], acc_ref.shape)

    acc_ref[...] += jnp.dot(xf_ref[...].astype(jnp.bfloat16), wbb_ref[...],
                            preferred_element_type=jnp.float32)

    @pl.when(k == pl.num_programs(1) - 1)
    def _():
        r = jnp.maximum(acc_ref[...], 0.0).astype(jnp.bfloat16)
        out_ref[...] = (jnp.dot(r, wf_ref[...], preferred_element_type=jnp.float32)
                        + bf_ref[...])


# ----------------------------------------------------------------------------- params


def init_params(key, flat_dim):
    """Deterministic params, PyTorch nn.Linear-style uniform(-1/sqrt(fan_in), ...)."""
    def linear(k, fan_in, fan_out):
        kw, kb = jax.random.split(k)
        bound = 1.0 / jnp.sqrt(float(fan_in))
        w = jax.random.uniform(kw, (fan_in, fan_out), jnp.float32, -bound, bound)
        b = jax.random.uniform(kb, (1, fan_out), jnp.float32, -bound, bound)
        return w, b

    k0, k1, k2 = jax.random.split(key, 3)
    wbb, bbb = linear(k0, flat_dim, IN_FEATURES)   # backbone stand-in
    w1, b1 = linear(k1, IN_FEATURES, 256)          # self.out layer 1
    w2, b2 = linear(k2, 256, NUM_CLASSES)          # self.out layer 2
    # self.emb (MLP([512, 512], final_relu=True)) is computed-but-unreturned in
    # the PyTorch forward; it is dead code for the module output and is dropped.
    return dict(wbb=wbb, bbb=bbb, w1=w1, b1=b1, w2=w2, b2=b2)


def prepare_kernel_params(params, k_pad):
    """Fold / cast / pad parameters into the kernel-friendly layout."""
    flat_dim = params["wbb"].shape[0]

    wbb = params["wbb"].astype(jnp.bfloat16)                   # (flat_dim, 512)
    if k_pad != flat_dim:
        # Zero K rows -> zero contribution from the padded x columns.
        wbb = jnp.pad(wbb, ((0, k_pad - flat_dim), (0, 0)))
    bbb = params["bbb"].astype(jnp.float32)                    # (1, 512)

    # Eval-mode fusion of the two `self.out` linears.
    w_fused = params["w1"] @ params["w2"]                      # (512, 8)  f32
    b_fused = params["b1"] @ params["w2"] + params["b2"]       # (1, 8)    f32

    # Lane-dense output slab: pad 8 -> 128 with zero columns.
    wf = jnp.zeros((IN_FEATURES, OUT_PAD), jnp.bfloat16)
    wf = wf.at[:, :NUM_CLASSES].set(w_fused.astype(jnp.bfloat16))
    bf = jnp.zeros((1, OUT_PAD), jnp.float32)
    bf = bf.at[:, :NUM_CLASSES].set(b_fused)
    return wbb, bbb, wf, bf


# ----------------------------------------------------------------------------- forward


def baseline_inc_forward(x, params):
    B = x.shape[0]
    flat_dim = math.prod(x.shape[1:])

    # Batch tile: multiple of 8 (sublane), capped at 512 (keeps the backbone GEMM
    # compute-bound even on v5e; 1024 also fine on v6e/v7x), and chosen so the
    # 'parallel' batch axis has >=2 grid steps when B allows it so both v7x
    # TensorCores get work.
    tb = min(512, max(8, _round_up(pl.cdiv(B, 2), 8)))
    b_pad = _round_up(B, tb)

    resident = flat_dim <= RESIDENT_MAX_FLAT_DIM
    if resident:
        tk = k_pad = flat_dim                      # whole weight resident, no K axis
    else:
        tk = min(2048, _round_up(flat_dim, 256))   # 256-rounding: no waste at 768 etc.
        k_pad = _round_up(flat_dim, tk)

    wbb, bbb, wf, bf = prepare_kernel_params(params, k_pad)

    # Flatten NCHW -> (B, flat_dim); stay f32 (cast to bf16 in-kernel) and pad
    # only what the tiling needs: a handful of batch rows, plus K columns in the
    # K-tiled fallback (zero columns x zero weight rows -> zero contribution).
    xf = x.reshape(B, flat_dim)
    if b_pad != B or k_pad != flat_dim:
        xf = jnp.pad(xf, ((0, b_pad - B), (0, k_pad - flat_dim)))

    # Explicit VMEM budget: double-buffered tiles + accumulator scratch + headroom.
    est = (_vmem_bytes((tb, tk), 4)                       # xf tile (f32)
           + _vmem_bytes((tk, IN_FEATURES), 2)            # wbb tile (bf16)
           + _vmem_bytes((1, IN_FEATURES), 4)             # bbb
           + _vmem_bytes((IN_FEATURES, OUT_PAD), 2)       # wf
           + _vmem_bytes((1, OUT_PAD), 4)                 # bf
           + _vmem_bytes((tb, OUT_PAD), 4)                # out tile
           + _vmem_bytes((tb, IN_FEATURES), 4, nbuf=1))   # acc scratch (K-tiled only)
    vmem_limit = min(max(est + 4 * 1024 * 1024, 16 * 1024 * 1024), 48 * 1024 * 1024)

    if resident:
        grid = (b_pad // tb,)
        kernel = baseline_inc_kernel_resident
        in_specs = [
            pl.BlockSpec((tb, flat_dim), lambda b: (b, 0)),               # xf
            pl.BlockSpec((flat_dim, IN_FEATURES), lambda b: (0, 0)),      # wbb (resident)
            pl.BlockSpec((1, IN_FEATURES), lambda b: (0, 0)),             # bbb
            pl.BlockSpec((IN_FEATURES, OUT_PAD), lambda b: (0, 0)),       # wf
            pl.BlockSpec((1, OUT_PAD), lambda b: (0, 0)),                 # bf
        ]
        out_specs = pl.BlockSpec((tb, OUT_PAD), lambda b: (b, 0))
        scratch_shapes = []
        dim_sem = ("parallel",)
    else:
        grid = (b_pad // tb, k_pad // tk)
        kernel = baseline_inc_kernel_ktiled
        in_specs = [
            pl.BlockSpec((tb, tk), lambda b, k: (b, k)),                  # xf
            pl.BlockSpec((tk, IN_FEATURES), lambda b, k: (k, 0)),         # wbb (streamed)
            pl.BlockSpec((1, IN_FEATURES), lambda b, k: (0, 0)),          # bbb
            pl.BlockSpec((IN_FEATURES, OUT_PAD), lambda b, k: (0, 0)),    # wf
            pl.BlockSpec((1, OUT_PAD), lambda b, k: (0, 0)),              # bf
        ]
        out_specs = pl.BlockSpec((tb, OUT_PAD), lambda b, k: (b, 0))
        scratch_shapes = [pltpu.VMEM((tb, IN_FEATURES), jnp.float32)]
        dim_sem = ("parallel", "arbitrary")

    out_padded = pl.pallas_call(
        kernel,
        out_shape=jax.ShapeDtypeStruct((b_pad, OUT_PAD), jnp.float32),
        grid_spec=pltpu.PrefetchScalarGridSpec(
            num_scalar_prefetch=0,
            grid=grid,
            in_specs=in_specs,
            out_specs=out_specs,
            scratch_shapes=scratch_shapes,
        ),
        compiler_params=pltpu.CompilerParams(
            dimension_semantics=dim_sem,
            vmem_limit_bytes=vmem_limit),
    )(xf, wbb, bbb, wf, bf)

    # Module forward returns only `out`; slice off batch and lane padding.
    return out_padded[:B, :NUM_CLASSES]


def baseline_inc_reference(x, params):
    """Pure-JAX f32 reference (eval mode) for tolerance validation."""
    B = x.shape[0]
    flat_dim = math.prod(x.shape[1:])
    xf = x.reshape(B, flat_dim)
    fea = xf @ params["wbb"] + params["bbb"]
    h = jnp.maximum(fea, 0.0) @ params["w1"] + params["b1"]
    return h @ params["w2"] + params["b2"]


if __name__ == "__main__":
    key = jax.random.PRNGKey(0)
    kx, kp = jax.random.split(key)

    # Small NCHW image consistent with an image-classification input.
    B, C, H, W = 2, 3, 16, 16
    x = jax.random.normal(kx, (B, C, H, W), dtype=jnp.float32)

    params = init_params(kp, C * H * W)

    out = baseline_inc_forward(x, params)
    out = jax.block_until_ready(out)
    assert out.shape == (B, NUM_CLASSES), out.shape

    # Validate against the f32 reference at bf16-level tolerance.
    ref = jax.block_until_ready(baseline_inc_reference(x, params))
    assert jnp.allclose(out, ref, atol=5e-2, rtol=5e-2), (
        float(jnp.max(jnp.abs(out - ref))))

    print("KERNEL_OK")
</pallas_src>

<mosaic_0001>
module attributes {stable_mosaic.version = 11 : i64} {
  func.func @baseline_inc_kernel_resident(%arg0: i32, %arg1: memref<8x768xf32, #tpu.memory_space<vmem>>, %arg2: memref<768x512xbf16, #tpu.memory_space<vmem>>, %arg3: memref<1x512xf32, #tpu.memory_space<vmem>>, %arg4: memref<512x128xbf16, #tpu.memory_space<vmem>>, %arg5: memref<1x128xf32, #tpu.memory_space<vmem>>, %arg6: memref<8x128xf32, #tpu.memory_space<vmem>>) attributes {dimension_semantics = [#tpu.dimension_semantics<parallel>], iteration_bounds = array<i64: 1>, scalar_prefetch = 0 : i64, scratch_operands = 0 : i64, tpu.core_type = #tpu.core_type<tc>, window_params = [{transform_indices = @transform_0, window_bounds = array<i64: 8, 768>}, {pipeline_mode = #tpu.pipeline_mode<synchronous>, transform_indices = @transform_1, window_bounds = array<i64: 768, 512>}, {pipeline_mode = #tpu.pipeline_mode<synchronous>, transform_indices = @transform_2, window_bounds = array<i64: 1, 512>}, {pipeline_mode = #tpu.pipeline_mode<synchronous>, transform_indices = @transform_3, window_bounds = array<i64: 512, 128>}, {pipeline_mode = #tpu.pipeline_mode<synchronous>, transform_indices = @transform_4, window_bounds = array<i64: 1, 128>}, {transform_indices = @transform_5, window_bounds = array<i64: 8, 128>}]} {
    %c0 = arith.constant 0 : index
    %c0_0 = arith.constant 0 : index
    %0 = vector.load %arg1[%c0, %c0_0] : memref<8x768xf32, #tpu.memory_space<vmem>>, vector<8x768xf32>
    %1 = arith.truncf %0 : vector<8x768xf32> to vector<8x768xbf16>
    %c0_1 = arith.constant 0 : index
    %c0_2 = arith.constant 0 : index
    %2 = vector.load %arg2[%c0_1, %c0_2] : memref<768x512xbf16, #tpu.memory_space<vmem>>, vector<768x512xbf16>
    %cst = arith.constant dense<0.000000e+00> : vector<8x512xf32>
    %3 = tpu.matmul %1, %2, %cst {dimension_numbers = #tpu.dot_dimension_numbers<[1], [0], [0], [1], [0, 0, 1, 1], [], []>} : vector<8x768xbf16>, vector<768x512xbf16>, vector<8x512xf32> -> vector<8x512xf32>
    %c0_3 = arith.constant 0 : index
    %c0_4 = arith.constant 0 : index
    %4 = vector.load %arg3[%c0_3, %c0_4] : memref<1x512xf32, #tpu.memory_space<vmem>>, vector<1x512xf32>
    %5 = vector.broadcast %4 : vector<1x512xf32> to vector<8x512xf32>
    %6 = arith.addf %3, %5 : vector<8x512xf32>
    %cst_5 = arith.constant 0.000000e+00 : f32
    %7 = vector.broadcast %cst_5 : f32 to vector<8x512xf32>
    %8 = arith.maximumf %6, %7 : vector<8x512xf32>
    %9 = arith.truncf %8 : vector<8x512xf32> to vector<8x512xbf16>
    %c0_6 = arith.constant 0 : index
    %c0_7 = arith.constant 0 : index
    %10 = vector.load %arg4[%c0_6, %c0_7] : memref<512x128xbf16, #tpu.memory_space<vmem>>, vector<512x128xbf16>
    %cst_8 = arith.constant dense<0.000000e+00> : vector<8x128xf32>
    %11 = tpu.matmul %9, %10, %cst_8 {dimension_numbers = #tpu.dot_dimension_numbers<[1], [0], [0], [1], [0, 0, 1, 1], [], []>} : vector<8x512xbf16>, vector<512x128xbf16>, vector<8x128xf32> -> vector<8x128xf32>
    %c0_9 = arith.constant 0 : index
    %c0_10 = arith.constant 0 : index
    %12 = vector.load %arg5[%c0_9, %c0_10] : memref<1x128xf32, #tpu.memory_space<vmem>>, vector<1x128xf32>
    %13 = vector.broadcast %12 : vector<1x128xf32> to vector<8x128xf32>
    %14 = arith.addf %11, %13 : vector<8x128xf32>
    %c0_11 = arith.constant 0 : index
    %c0_12 = arith.constant 0 : index
    %15 = vector.load %arg6[%c0_11, %c0_12] : memref<8x128xf32, #tpu.memory_space<vmem>>, vector<8x128xf32>
    tpu.vector_store %arg6[%c0_11, %c0_12], %14 {strides = array<i32>} : memref<8x128xf32, #tpu.memory_space<vmem>>, vector<8x128xf32>,
    return
  }
  func.func @transform_0(%arg0: i32) -> (i32, i32) {
    %c0_i32 = arith.constant 0 : i32
    %c0_i32_0 = arith.constant 0 : i32
    return %arg0, %c0_i32 : i32, i32
  }
  func.func @transform_1(%arg0: i32) -> (i32, i32) {
    %c0_i32 = arith.constant 0 : i32
    %c0_i32_0 = arith.constant 0 : i32
    %c0_i32_1 = arith.constant 0 : i32
    return %c0_i32, %c0_i32_0 : i32, i32
  }
  func.func @transform_2(%arg0: i32) -> (i32, i32) {
    %c0_i32 = arith.constant 0 : i32
    %c0_i32_0 = arith.constant 0 : i32
    %c0_i32_1 = arith.constant 0 : i32
    return %c0_i32, %c0_i32_0 : i32, i32
  }
  func.func @transform_3(%arg0: i32) -> (i32, i32) {
    %c0_i32 = arith.constant 0 : i32
    %c0_i32_0 = arith.constant 0 : i32
    %c0_i32_1 = arith.constant 0 : i32
    return %c0_i32, %c0_i32_0 : i32, i32
  }
  func.func @transform_4(%arg0: i32) -> (i32, i32) {
    %c0_i32 = arith.constant 0 : i32
    %c0_i32_0 = arith.constant 0 : i32
    %c0_i32_1 = arith.constant 0 : i32
    return %c0_i32, %c0_i32_0 : i32, i32
  }
  func.func @transform_5(%arg0: i32) -> (i32, i32) {
    %c0_i32 = arith.constant 0 : i32
    %c0_i32_0 = arith.constant 0 : i32
    return %arg0, %c0_i32 : i32, i32
  }
}

</mosaic_0001>

<bundles_post_ra>
// kernel: tpu_custom_call.1
= control target key start
LH: loop header
LB: loop body
LE: loop exit
PB: predicated region body
PF: predicated region fallthrough
CT: control target
= control target key end

     0   :  { %10 = vsyncpa [#allocation3], 0  ;;  %s2661_s0 = inlined_call_operand.hbm [shape: f32[8,768], index: 0, kind: input, shape index: {}]   ;;  %s2662_s1 = inlined_call_operand.hbm [shape: bf16[768,512], index: 1, kind: input, shape index: {}]   ;;  %s2663_s2 = inlined_call_operand.hbm [shape: f32[1,512], index: 2, kind: input, shape index: {}]   ;;  %s2664_s3 = inlined_call_operand.hbm [shape: bf16[512,128], index: 3, kind: input, shape index: {}]   ;;  %s2665_s4 = inlined_call_operand.vmem [shape: f32[1,128], index: 4, kind: input, shape index: {}]   ;;  %s2666_s5 = inlined_call_operand.hbm [shape: f32[8,128], index: 5, kind: output, shape index: {}]  }
   0x1   :  { %11 = vsyncpa [#allocation6], 0 }
   0x2   :  { %12 = vsyncpa [#allocation9], 0 }
   0x3   :  { %13 = vsyncpa [#allocation4], 0  ;;  %s2580_s18 = smov [#allocation5]  }
   0x4   :  { %s29_s19 = sshll.u32 %s2580_s18, 4  ;;  %s30_s19 = int_to_ptr.vmem [resolvable:$true] %s29_s19 }
   0x5   :  { %s2480_s20 = scalar_lea.vmem %s30_s19, 24576  ;;  %p2485_p1 = scmp.lt.s32.totalorder %s30_s19, %s30_s19 }
   0x6   :  { %p2481_p0 = scmp.ne.s32.totalorder %s30_s19, %s2480_s20  ;;  %p2486_p2 = scmp.lt.s32.totalorder %s2480_s20, %s2480_s20 }
   0x8   :  { %p2487_p3 = por %p2486_p2, %p2485_p1 }
   0xa   :  { %p2488_p4 = pnand %p2487_p3, %p2481_p0 }
   0xc   :  { %2491 = shalt.err (!%p2488_p4)
}
   0xd   :  { %s2581_s21 = smov 256   ;;  %s2582_s22 = smov 16  }
   0xe   :  { %35 = dma.hbm_to_vmem [thread:$0]  %s2662_s1, 24576, %s30_s19, [#allocation6], %s2581_s21, %s2581_s21, %s2582_s22  }
   0xf   :  { %s2583_s25 = smov [#allocation2]   ;;  %s2584_s27 = smov [#allocation7]  }
  0x10   :  { %s20_s26 = sshll.u32 %s2583_s25, 4  ;;  %s42_s28 = sshll.u32 %s2584_s27, 4  ;;  %s21_s26 = int_to_ptr.vmem [resolvable:$true] %s20_s26  ;;  %s43_s28 = int_to_ptr.vmem [resolvable:$true] %s42_s28 }
  0x11   :  { %s2500_s29 = scalar_lea.vmem %s21_s26, 768  ;;  %p2505_p6 = scmp.lt.s32.totalorder %s21_s26, %s21_s26 }
  0x12   :  { %p2501_p5 = scmp.ne.s32.totalorder %s21_s26, %s2500_s29  ;;  %p2506_p7 = scmp.lt.s32.totalorder %s2500_s29, %s2500_s29 }
  0x14   :  { %p2507_p8 = por %p2506_p7, %p2505_p6 }
  0x16   :  { %p2508_p9 = pnand %p2507_p8, %p2501_p5 }
  0x18   :  { %2511 = shalt.err (!%p2508_p9)
}
  0x19   :  { %23 = dma.hbm_to_vmem [thread:$0]  %s2661_s0, 768, %s21_s26, [#allocation3]  }
  0x1a   :  { %s2520_s7 = scalar_lea.vmem %s43_s28, 64  ;;  %p2525_p11 = scmp.lt.s32.totalorder %s43_s28, %s43_s28 }
  0x1b   :  { %p2521_p10 = scmp.ne.s32.totalorder %s43_s28, %s2520_s7  ;;  %p2526_p12 = scmp.lt.s32.totalorder %s2520_s7, %s2520_s7 }
  0x1d   :  { %p2527_p13 = por %p2526_p12, %p2525_p11 }
  0x1f   :  { %p2528_p0 = pnand %p2527_p13, %p2521_p10 }
  0x21   :  { %2531 = shalt.err (!%p2528_p0)
}
  0x22   :  { %45 = dma.hbm_to_vmem [thread:$0]  %s2663_s2, 64, %s43_s28, [#allocation6]  }
  0x23   :  { %s2585_s9 = smov [#allocation8]  }
  0x24   :  { %s51_s10 = sshll.u32 %s2585_s9, 4  ;;  %s52_s10 = int_to_ptr.vmem [resolvable:$true] %s51_s10 }
  0x25   :  { %s2540_s11 = scalar_lea.vmem %s52_s10, 4096  ;;  %p2545_p2 = scmp.lt.s32.totalorder %s52_s10, %s52_s10 }
  0x26   :  { %p2541_p1 = scmp.ne.s32.totalorder %s52_s10, %s2540_s11  ;;  %p2546_p3 = scmp.lt.s32.totalorder %s2540_s11, %s2540_s11 }
  0x28   :  { %p2547_p4 = por %p2546_p3, %p2545_p2 }
  0x2a   :  { %p2548_p5 = pnand %p2547_p4, %p2541_p1 }
  0x2c   :  { %2551 = shalt.err (!%p2548_p5)
}
  0x2d   :  { %s2586_s0 = smov 64   ;;  %s2587_s12 = smov 4  }
  0x2e   :  { %57 = dma.hbm_to_vmem [thread:$0]  %s2664_s3, 4096, %s52_s10, [#allocation9], %s2586_s0, %s2586_s0, %s2587_s12  }
  0x2f   :  { %2572 = dma.done.wait [#allocation3], 768  }
  0x30   :  { %2573 = vsyncadd [#allocation3], 4294966528 }
  0x31   :  { %2574 = dma.done.wait [#allocation6], 24640  }
  0x32   :  { %2575 = vsyncadd [#allocation6], 4294942656 }
  0x33   :  { %2576 = dma.done.wait [#allocation9], 4096  }
  0x34   :  { %2577 = vsyncadd [#allocation9], 4294963200  ;;  %v2152_v0 = vld [vmem:[#allocation5 + $0xe4] ss:$16 sps:$4 sm:$0xff]   ;;  %v2156_v2 = vld [vmem:[#allocation5 + $0xe0] ss:$16 sps:$4 sm:$0xff]  }
  0x35   :  { %v2154_v1 = vld [vmem:[#allocation5 + $0x2e4] ss:$16 sps:$4 sm:$0xff]   ;;  %1259 = vmatprep.subr.bf16.mxu0 %v2152_v0  ;;  %v2157_v3 = vld [vmem:[#allocation5 + $0x2e0] ss:$16 sps:$4 sm:$0xff]   ;;  %v74_v46 = vld [vmem:[#allocation2 + $0x8] sm:$0xff]  ;;  %s2588_s15 = smov [#allocation10]  }
  0x36   :  { %1300 = vmatprep.subr.bf16.mxu1 %v2154_v1  ;;  %v2158_v4 = vld [vmem:[#allocation5 + $0xc4] ss:$16 sps:$4 sm:$0xff]   ;;  %1260 = vmatpush1.bf16.msra.mxu0 %v2156_v2  ;;  %v2162_v6 = vld [vmem:[#allocation5 + $0xc0] ss:$16 sps:$4 sm:$0xff]   ;;  %v2631_v49 = vpack.c.bf16 %v74_v46, %v74_v46  ;;  %v76_v50 = vld [vmem:[#allocation2 + $0x18] sm:$0xff]  ;;  %s1863_s16 = sshll.u32 %s2588_s15, 4  ;;  %s1864_s16 = int_to_ptr.vmem [resolvable:$true] %s1863_s16 }
  0x37   :  { %1301 = vmatpush1.bf16.msra.mxu1 %v2157_v3  ;;  %v2160_v5 = vld [vmem:[#allocation5 + $0x2c4] ss:$16 sps:$4 sm:$0xff]   ;;  %1261 = vmatprep.subr.bf16.mxu0 %v2158_v4  ;;  %v2163_v7 = vld [vmem:[#allocation5 + $0x2c0] ss:$16 sps:$4 sm:$0xff]   ;;  %v2633_v52 = vpack.c.bf16 %v76_v50, %v76_v50  ;;  %s2552_s17 = scalar_lea.vmem %s1864_s16, 128  ;;  %p2557_p7 = scmp.lt.s32.totalorder %s1864_s16, %s1864_s16 }
  0x38   :  { %1302 = vmatprep.subr.bf16.mxu1 %v2160_v5  ;;  %v2164_v8 = vld [vmem:[#allocation5 + $0xa4] ss:$16 sps:$4 sm:$0xff]   ;;  %v2168_v10 = vld [vmem:[#allocation5 + $0xa0] ss:$16 sps:$4 sm:$0xff]   ;;  %1291 = vmatprep.mubr.bf16.mxu0 %v2631_v49  ;;  %p2553_p6 = scmp.ne.s32.totalorder %s1864_s16, %s2552_s17  ;;  %p2558_p8 = scmp.lt.s32.totalorder %s2552_s17, %s2552_s17 }
  0x39   :  { %v2166_v9 = vld [vmem:[#allocation5 + $0x2a4] ss:$16 sps:$4 sm:$0xff]   ;;  %v2169_v11 = vld [vmem:[#allocation5 + $0x2a0] ss:$16 sps:$4 sm:$0xff]   ;;  %1332 = vmatprep.mubr.bf16.mxu1 %v2633_v52 }
  0x3a   :  { %1262 = vmatpush1.bf16.msra.mxu0 %v2162_v6  ;;  %v2170_v12 = vld [vmem:[#allocation5 + $0x84] ss:$16 sps:$4 sm:$0xff]   ;;  %v2174_v14 = vld [vmem:[#allocation5 + $0x80] ss:$16 sps:$4 sm:$0xff]   ;;  %p2559_p9 = por %p2558_p8, %p2557_p7 }
  0x3b   :  { %1303 = vmatpush1.bf16.msra.mxu1 %v2163_v7  ;;  %1263 = vmatprep.subr.bf16.mxu0 %v2164_v8  ;;  %v2172_v13 = vld [vmem:[#allocation5 + $0x284] ss:$16 sps:$4 sm:$0xff]   ;;  %v2175_v15 = vld [vmem:[#allocation5 + $0x280] ss:$16 sps:$4 sm:$0xff]   ;;  %v2253_v7 = vld [vmem:[#allocation5 + $0xec] ss:$16 sps:$4 sm:$0xff]  }
  0x3c   :  { %1304 = vmatprep.subr.bf16.mxu1 %v2166_v9  ;;  %v2176_v16 = vld [vmem:[#allocation5 + $0x64] ss:$16 sps:$4 sm:$0xff]   ;;  %v2180_v18 = vld [vmem:[#allocation5 + $0x60] ss:$16 sps:$4 sm:$0xff]   ;;  %p2560_p10 = pnand %p2559_p9, %p2553_p6 }
  0x3d   :  { %v2178_v17 = vld [vmem:[#allocation5 + $0x264] ss:$16 sps:$4 sm:$0xff]   ;;  %v2181_v19 = vld [vmem:[#allocation5 + $0x260] ss:$16 sps:$4 sm:$0xff]  }
  0x3e   :  { %1264 = vmatpush1.bf16.msra.mxu0 %v2168_v10  ;;  %v2182_v20 = vld [vmem:[#allocation5 + $0x44] ss:$16 sps:$4 sm:$0xff]   ;;  %v2186_v22 = vld [vmem:[#allocation5 + $0x40] ss:$16 sps:$4 sm:$0xff]  }
  0x3f   :  { %1305 = vmatpush1.bf16.msra.mxu1 %v2169_v11  ;;  %1265 = vmatprep.subr.bf16.mxu0 %v2170_v12  ;;  %v2184_v21 = vld [vmem:[#allocation5 + $0x244] ss:$16 sps:$4 sm:$0xff]   ;;  %v2187_v23 = vld [vmem:[#allocation5 + $0x240] ss:$16 sps:$4 sm:$0xff]   ;;  %v2251_v11 = vld [vmem:[#allocation5 + $0xe8] ss:$16 sps:$4 sm:$0xff]  }
  0x40   :  { %1306 = vmatprep.subr.bf16.mxu1 %v2172_v13  ;;  %v2188_v24 = vld [vmem:[#allocation5 + $0x24] ss:$16 sps:$4 sm:$0xff]   ;;  %v2192_v26 = vld [vmem:[#allocation5 + $0x20] ss:$16 sps:$4 sm:$0xff]   ;;  %v2259_v13 = vld [vmem:[#allocation5 + $0xcc] ss:$16 sps:$4 sm:$0xff]  }
  0x41   :  { %v2190_v25 = vld [vmem:[#allocation5 + $0x224] ss:$16 sps:$4 sm:$0xff]   ;;  %v2193_v27 = vld [vmem:[#allocation5 + $0x220] ss:$16 sps:$4 sm:$0xff]  }
  0x42   :  { %1266 = vmatpush1.bf16.msra.mxu0 %v2174_v14  ;;  %v2194_v28 = vld [vmem:[#allocation5 + $0x4] ss:$16 sps:$4 sm:$0xff]   ;;  %v2198_v30 = vld [vmem:[#allocation5] ss:$16 sps:$4 sm:$0xff]  }
  0x43   :  { %1307 = vmatpush1.bf16.msra.mxu1 %v2175_v15  ;;  %1267 = vmatprep.subr.bf16.mxu0 %v2176_v16  ;;  %v2196_v29 = vld [vmem:[#allocation5 + $0x204] ss:$16 sps:$4 sm:$0xff]   ;;  %v2199_v31 = vld [vmem:[#allocation5 + $0x200] ss:$16 sps:$4 sm:$0xff]   ;;  %v2257_v15 = vld [vmem:[#allocation5 + $0xc8] ss:$16 sps:$4 sm:$0xff]  }
  0x44   :  { %1308 = vmatprep.subr.bf16.mxu1 %v2178_v17  ;;  %v2200_v32 = vld [vmem:[#allocation5 + $0x1e4] ss:$16 sps:$4 sm:$0xff]   ;;  %v2204_v34 = vld [vmem:[#allocation5 + $0x1e0] ss:$16 sps:$4 sm:$0xff]   ;;  %v2265_v17 = vld [vmem:[#allocation5 + $0xac] ss:$16 sps:$4 sm:$0xff]  }
  0x45   :  { %v2202_v33 = vld [vmem:[#allocation5 + $0x3e4] ss:$16 sps:$4 sm:$0xff]   ;;  %v2205_v35 = vld [vmem:[#allocation5 + $0x3e0] ss:$16 sps:$4 sm:$0xff]  }
  0x46   :  { %1268 = vmatpush1.bf16.msra.mxu0 %v2180_v18  ;;  %v2206_v36 = vld [vmem:[#allocation5 + $0x1c4] ss:$16 sps:$4 sm:$0xff]   ;;  %v2210_v38 = vld [vmem:[#allocation5 + $0x1c0] ss:$16 sps:$4 sm:$0xff]  }
  0x47   :  { %1309 = vmatpush1.bf16.msra.mxu1 %v2181_v19  ;;  %1269 = vmatprep.subr.bf16.mxu0 %v2182_v20  ;;  %v2208_v37 = vld [vmem:[#allocation5 + $0x3c4] ss:$16 sps:$4 sm:$0xff]   ;;  %v2211_v39 = vld [vmem:[#allocation5 + $0x3c0] ss:$16 sps:$4 sm:$0xff]   ;;  %v2263_v19 = vld [vmem:[#allocation5 + $0xa8] ss:$16 sps:$4 sm:$0xff]  }
  0x48   :  { %1310 = vmatprep.subr.bf16.mxu1 %v2184_v21  ;;  %v2212_v40 = vld [vmem:[#allocation5 + $0x1a4] ss:$16 sps:$4 sm:$0xff]   ;;  %v2216_v42 = vld [vmem:[#allocation5 + $0x1a0] ss:$16 sps:$4 sm:$0xff]   ;;  %v2271_v21 = vld [vmem:[#allocation5 + $0x8c] ss:$16 sps:$4 sm:$0xff]  }
  0x49   :  { %v2214_v41 = vld [vmem:[#allocation5 + $0x3a4] ss:$16 sps:$4 sm:$0xff]   ;;  %v2217_v43 = vld [vmem:[#allocation5 + $0x3a0] ss:$16 sps:$4 sm:$0xff]  }
  0x4a   :  { %1270 = vmatpush1.bf16.msra.mxu0 %v2186_v22  ;;  %v2218_v44 = vld [vmem:[#allocation5 + $0x184] ss:$16 sps:$4 sm:$0xff]   ;;  %v2222_v47 = vld [vmem:[#allocation5 + $0x180] ss:$16 sps:$4 sm:$0xff]  }
  0x4b   :  { %1311 = vmatpush1.bf16.msra.mxu1 %v2187_v23  ;;  %1271 = vmatprep.subr.bf16.mxu0 %v2188_v24  ;;  %v2220_v45 = vld [vmem:[#allocation5 + $0x384] ss:$16 sps:$4 sm:$0xff]   ;;  %v2223_v48 = vld [vmem:[#allocation5 + $0x380] ss:$16 sps:$4 sm:$0xff]   ;;  %v2269_v23 = vld [vmem:[#allocation5 + $0x88] ss:$16 sps:$4 sm:$0xff]  }
  0x4c   :  { %1312 = vmatprep.subr.bf16.mxu1 %v2190_v25  ;;  %v2224_v51 = vld [vmem:[#allocation5 + $0x164] ss:$16 sps:$4 sm:$0xff]   ;;  %v2228_v54 = vld [vmem:[#allocation5 + $0x160] ss:$16 sps:$4 sm:$0xff]   ;;  %v2277_v25 = vld [vmem:[#allocation5 + $0x6c] ss:$16 sps:$4 sm:$0xff]  }
  0x4d   :  { %v2226_v53 = vld [vmem:[#allocation5 + $0x364] ss:$16 sps:$4 sm:$0xff]   ;;  %v2229_v55 = vld [vmem:[#allocation5 + $0x360] ss:$16 sps:$4 sm:$0xff]  }
  0x4e   :  { %1272 = vmatpush1.bf16.msra.mxu0 %v2192_v26  ;;  %v2230_v56 = vld [vmem:[#allocation5 + $0x144] ss:$16 sps:$4 sm:$0xff]   ;;  %v2234_v58 = vld [vmem:[#allocation5 + $0x140] ss:$16 sps:$4 sm:$0xff]  }
  0x4f   :  { %1313 = vmatpush1.bf16.msra.mxu1 %v2193_v27  ;;  %1273 = vmatprep.subr.bf16.mxu0 %v2194_v28  ;;  %v2232_v57 = vld [vmem:[#allocation5 + $0x344] ss:$16 sps:$4 sm:$0xff]   ;;  %v2235_v59 = vld [vmem:[#allocation5 + $0x340] ss:$16 sps:$4 sm:$0xff]   ;;  %v2275_v27 = vld [vmem:[#allocation5 + $0x68] ss:$16 sps:$4 sm:$0xff]  }
  0x50   :  { %1314 = vmatprep.subr.bf16.mxu1 %v2196_v29  ;;  %v2236_v60 = vld [vmem:[#allocation5 + $0x124] ss:$16 sps:$4 sm:$0xff]   ;;  %v2240_v62 = vld [vmem:[#allocation5 + $0x120] ss:$16 sps:$4 sm:$0xff]   ;;  %v2283_v29 = vld [vmem:[#allocation5 + $0x4c] ss:$16 sps:$4 sm:$0xff]  }
  0x51   :  { %v2238_v61 = vld [vmem:[#allocation5 + $0x324] ss:$16 sps:$4 sm:$0xff]   ;;  %v2241_v63 = vld [vmem:[#allocation5 + $0x320] ss:$16 sps:$4 sm:$0xff]  }
  0x52   :  { %1274 = vmatpush1.bf16.msra.mxu0 %v2198_v30  ;;  %v2242_v0 = vld [vmem:[#allocation5 + $0x104] ss:$16 sps:$4 sm:$0xff]   ;;  %v2246_v2 = vld [vmem:[#allocation5 + $0x100] ss:$16 sps:$4 sm:$0xff]  }
  0x53   :  { %1315 = vmatpush1.bf16.msra.mxu1 %v2199_v31  ;;  %1275 = vmatprep.subr.bf16.mxu0 %v2200_v32  ;;  %v2244_v1 = vld [vmem:[#allocation5 + $0x304] ss:$16 sps:$4 sm:$0xff]   ;;  %v2247_v3 = vld [vmem:[#allocation5 + $0x300] ss:$16 sps:$4 sm:$0xff]   ;;  %v2281_v31 = vld [vmem:[#allocation5 + $0x48] ss:$16 sps:$4 sm:$0xff]  }
  0x54   :  { %1316 = vmatprep.subr.bf16.mxu1 %v2202_v33  ;;  %v73_v4 = vld [vmem:[#allocation2] sm:$0xff]  ;;  %v75_v5 = vld [vmem:[#allocation2 + $0x10] sm:$0xff]  ;;  %v2289_v33 = vld [vmem:[#allocation5 + $0x2c] ss:$16 sps:$4 sm:$0xff]  }
  0x55   :  { %v2250_v6 = vld [vmem:[#allocation5 + $0x4e4] ss:$16 sps:$4 sm:$0xff]   ;;  %v2637_v8 = vpack.c.bf16 %v73_v4, %v73_v4  ;;  %v2639_v9 = vpack.c.bf16 %v75_v5, %v75_v5  ;;  %v2248_v10 = vld [vmem:[#allocation5 + $0x4e0] ss:$16 sps:$4 sm:$0xff]   ;;  %v2337_v4 = vld [vmem:[#allocation5 + $0x12c] ss:$16 sps:$4 sm:$0xff]  }
  0x56   :  { %1276 = vmatpush2.bf16.msra.mxu0 %v2204_v34  ;;  %v2256_v12 = vld [vmem:[#allocation5 + $0x4c4] ss:$16 sps:$4 sm:$0xff]   ;;  %v2254_v14 = vld [vmem:[#allocation5 + $0x4c0] ss:$16 sps:$4 sm:$0xff]   ;;  %v78_v34 = vld [vmem:[#allocation2 + $0x28] sm:$0xff] }
  0x57   :  { %1317 = vmatpush2.bf16.msra.mxu1 %v2205_v35  ;;  %1277 = vmatprep.subr.bf16.mxu0 %v2206_v36  ;;  %v2262_v16 = vld [vmem:[#allocation5 + $0x4a4] ss:$16 sps:$4 sm:$0xff]   ;;  %v2260_v18 = vld [vmem:[#allocation5 + $0x4a0] ss:$16 sps:$4 sm:$0xff]   ;;  %v2644_v35 = vpack.c.bf16 %v78_v34, %v78_v34  ;;  %v2376_v34 = vld [vmem:[#allocation5 + $0x24c] ss:$16 sps:$4 sm:$0xff]  }
  0x58   :  { %1318 = vmatprep.subr.bf16.mxu1 %v2208_v37  ;;  %v2268_v20 = vld [vmem:[#allocation5 + $0x484] ss:$16 sps:$4 sm:$0xff]   ;;  %v2266_v22 = vld [vmem:[#allocation5 + $0x480] ss:$16 sps:$4 sm:$0xff]   ;;  %v2287_v37 = vld [vmem:[#allocation5 + $0x28] ss:$16 sps:$4 sm:$0xff]  }
  0x59   :  { %v2274_v24 = vld [vmem:[#allocation5 + $0x464] ss:$16 sps:$4 sm:$0xff]   ;;  %v2272_v26 = vld [vmem:[#allocation5 + $0x460] ss:$16 sps:$4 sm:$0xff]  }
  0x5a   :  { %1278 = vmatpush2.bf16.msra.mxu0 %v2210_v38  ;;  %v2280_v28 = vld [vmem:[#allocation5 + $0x444] ss:$16 sps:$4 sm:$0xff]   ;;  %v2278_v30 = vld [vmem:[#allocation5 + $0x440] ss:$16 sps:$4 sm:$0xff]  }
  0x5b   :  { %1319 = vmatpush2.bf16.msra.mxu1 %v2211_v39  ;;  %1279 = vmatprep.subr.bf16.mxu0 %v2212_v40  ;;  %v2286_v32 = vld [vmem:[#allocation5 + $0x424] ss:$16 sps:$4 sm:$0xff]   ;;  %v2284_v36 = vld [vmem:[#allocation5 + $0x420] ss:$16 sps:$4 sm:$0xff]   ;;  %v2295_v39 = vld [vmem:[#allocation5 + $0xc] ss:$16 sps:$4 sm:$0xff]  }
  0x5c   :  { %1320 = vmatprep.subr.bf16.mxu1 %v2214_v41  ;;  %v2292_v38 = vld [vmem:[#allocation5 + $0x404] ss:$16 sps:$4 sm:$0xff]   ;;  %v2290_v40 = vld [vmem:[#allocation5 + $0x400] ss:$16 sps:$4 sm:$0xff]   ;;  %v2293_v41 = vld [vmem:[#allocation5 + $0x8] ss:$16 sps:$4 sm:$0xff]  }
  0x5d   :  { %v2304_v46 = vld [vmem:[#allocation5 + $0x5c4] ss:$16 sps:$4 sm:$0xff]   ;;  %v2332_v5 = vld [vmem:[#allocation5 + $0x520] ss:$16 sps:$4 sm:$0xff]  }
  0x5e   :  { %1280 = vmatpush2.bf16.msra.mxu0 %v2216_v42  ;;  %v2298_v42 = vld [vmem:[#allocation5 + $0x5e4] ss:$16 sps:$4 sm:$0xff]  }
  0x5f   :  { %1321 = vmatpush2.bf16.msra.mxu1 %v2217_v43  ;;  %1281 = vmatprep.subr.bf16.mxu0 %v2218_v44  ;;  %v2301_v43 = vld [vmem:[#allocation5 + $0x1ec] ss:$16 sps:$4 sm:$0xff]   ;;  %v2296_v44 = vld [vmem:[#allocation5 + $0x5e0] ss:$16 sps:$4 sm:$0xff]   ;;  %v2310_v50 = vld [vmem:[#allocation5 + $0x5a4] ss:$16 sps:$4 sm:$0xff]  }
  0x60   :  { %1322 = vmatprep.subr.bf16.mxu1 %v2220_v45  ;;  %v2299_v45 = vld [vmem:[#allocation5 + $0x1e8] ss:$16 sps:$4 sm:$0xff]  }
  0x62   :  { %1282 = vmatpush2.bf16.msra.mxu0 %v2222_v47  ;;  %v2307_v47 = vld [vmem:[#allocation5 + $0x1cc] ss:$16 sps:$4 sm:$0xff]  }
  0x63   :  { %1323 = vmatpush2.bf16.msra.mxu1 %v2223_v48  ;;  %1283 = vmatprep.subr.bf16.mxu0 %v2224_v51  ;;  %v2302_v48 = vld [vmem:[#allocation5 + $0x5c0] ss:$16 sps:$4 sm:$0xff]   ;;  %v2313_v51 = vld [vmem:[#allocation5 + $0x1ac] ss:$16 sps:$4 sm:$0xff]  }
  0x64   :  { %1324 = vmatprep.subr.bf16.mxu1 %v2226_v53  ;;  %v2308_v53 = vld [vmem:[#allocation5 + $0x5a0] ss:$16 sps:$4 sm:$0xff]  }
  0x66   :  { %1284 = vmatpush2.bf16.msra.mxu0 %v2228_v54  ;;  %v2311_v54 = vld [vmem:[#allocation5 + $0x1a8] ss:$16 sps:$4 sm:$0xff]  }
  0x67   :  { %1325 = vmatpush2.bf16.msra.mxu1 %v2229_v55  ;;  %1285 = vmatprep.subr.bf16.mxu0 %v2230_v56  ;;  %v2316_v55 = vld [vmem:[#allocation5 + $0x584] ss:$16 sps:$4 sm:$0xff]   ;;  %v2319_v56 = vld [vmem:[#allocation5 + $0x18c] ss:$16 sps:$4 sm:$0xff]  }
  0x68   :  { %1326 = vmatprep.subr.bf16.mxu1 %v2232_v57  ;;  %v2314_v57 = vld [vmem:[#allocation5 + $0x580] ss:$16 sps:$4 sm:$0xff]  }
  0x6a   :  { %1286 = vmatpush2.bf16.msra.mxu0 %v2234_v58  ;;  %v2317_v58 = vld [vmem:[#allocation5 + $0x188] ss:$16 sps:$4 sm:$0xff]  }
  0x6b   :  { %1327 = vmatpush2.bf16.msra.mxu1 %v2235_v59  ;;  %1287 = vmatprep.subr.bf16.mxu0 %v2236_v60  ;;  %v2322_v59 = vld [vmem:[#allocation5 + $0x564] ss:$16 sps:$4 sm:$0xff]   ;;  %v2325_v60 = vld [vmem:[#allocation5 + $0x16c] ss:$16 sps:$4 sm:$0xff]  }
  0x6c   :  { %1328 = vmatprep.subr.bf16.mxu1 %v2238_v61  ;;  %v2320_v61 = vld [vmem:[#allocation5 + $0x560] ss:$16 sps:$4 sm:$0xff]  }
  0x6e   :  { %1288 = vmatpush2.bf16.msra.mxu0 %v2240_v62  ;;  %v2323_v62 = vld [vmem:[#allocation5 + $0x168] ss:$16 sps:$4 sm:$0xff]  }
  0x6f   :  { %1329 = vmatpush2.bf16.msra.mxu1 %v2241_v63  ;;  %1289 = vmatprep.subr.bf16.mxu0 %v2242_v0  ;;  %v2328_v63 = vld [vmem:[#allocation5 + $0x544] ss:$16 sps:$4 sm:$0xff]   ;;  %v2331_v0 = vld [vmem:[#allocation5 + $0x14c] ss:$16 sps:$4 sm:$0xff]  }
  0x70   :  { %1330 = vmatprep.subr.bf16.mxu1 %v2244_v1  ;;  %v2326_v1 = vld [vmem:[#allocation5 + $0x540] ss:$16 sps:$4 sm:$0xff]  }
  0x72   :  { %1290 = vmatpush2.bf16.msra.mxu0 %v2246_v2  ;;  %v2329_v2 = vld [vmem:[#allocation5 + $0x148] ss:$16 sps:$4 sm:$0xff]  }
  0x73   :  { %1331 = vmatpush2.bf16.msra.mxu1 %v2247_v3  ;;  %1341 = vmatprep.subr.bf16.mxu0 %v2250_v6  ;;  %v2334_v3 = vld [vmem:[#allocation5 + $0x524] ss:$16 sps:$4 sm:$0xff]   ;;  %v2335_v6 = vld [vmem:[#allocation5 + $0x128] ss:$16 sps:$4 sm:$0xff]  }
  0x74   :  { %1382 = vmatprep.subr.bf16.mxu1 %v2253_v7  ;;  %v2340_v7 = vld [vmem:[#allocation5 + $0x504] ss:$16 sps:$4 sm:$0xff]  }
  0x75   :  { %1292 = vmatmul.mubr.bf16.vlgmr.msra.gmra.mxu0 %v2637_v8 }
  0x76   :  { %1333 = vmatmul.mubr.bf16.vlgmr.msra.gmra.mxu1 %v2639_v9  ;;  %1342 = vmatpush1.bf16.msra.mxu0 %v2248_v10  ;;  %v2343_v10 = vld [vmem:[#allocation5 + $0x10c] ss:$16 sps:$4 sm:$0xff]  }
  0x77   :  { %1383 = vmatpush1.bf16.msra.mxu1 %v2251_v11  ;;  %1343 = vmatprep.subr.bf16.mxu0 %v2256_v12  ;;  %v2338_v11 = vld [vmem:[#allocation5 + $0x500] ss:$16 sps:$4 sm:$0xff]   ;;  %v2341_v12 = vld [vmem:[#allocation5 + $0x108] ss:$16 sps:$4 sm:$0xff]  }
  0x78   :  { %1384 = vmatprep.subr.bf16.mxu1 %v2259_v13  ;;  %1414 = vmatprep.mubr.bf16.mxu1 %v2631_v49  ;;  %v2305_v49 = vld [vmem:[#allocation5 + $0x1c8] ss:$16 sps:$4 sm:$0xff]   ;;  %v77_v13 = vld [vmem:[#allocation2 + $0x20] sm:$0xff] }
  0x79   :  { %1373 = vmatprep.mubr.bf16.mxu0 %v2644_v35 }
  0x7a   :  { %1344 = vmatpush1.bf16.msra.mxu0 %v2254_v14  ;;  %v2346_v14 = vld [vmem:[#allocation5 + $0x2ec] ss:$16 sps:$4 sm:$0xff]  }
  0x7b   :  { %1385 = vmatpush1.bf16.msra.mxu1 %v2257_v15  ;;  %1345 = vmatprep.subr.bf16.mxu0 %v2262_v16  ;;  %v2349_v15 = vld [vmem:[#allocation5 + $0x4ec] ss:$16 sps:$4 sm:$0xff]   ;;  %v2647_v16 = vpack.c.bf16 %v77_v13, %v77_v13 }
  0x7c   :  { %1386 = vmatprep.subr.bf16.mxu1 %v2265_v17  ;;  %v2344_v17 = vld [vmem:[#allocation5 + $0x2e8] ss:$16 sps:$4 sm:$0xff]   ;;  %v2439_v13 = vld [vmem:[#allocation5 + $0x50c] ss:$16 sps:$4 sm:$0xff]  }
  0x7e   :  { %1346 = vmatpush1.bf16.msra.mxu0 %v2260_v18  ;;  %v2347_v18 = vld [vmem:[#allocation5 + $0x4e8] ss:$16 sps:$4 sm:$0xff]  }
  0x7f   :  { %1387 = vmatpush1.bf16.msra.mxu1 %v2263_v19  ;;  %1347 = vmatprep.subr.bf16.mxu0 %v2268_v20  ;;  %v2352_v19 = vld [vmem:[#allocation5 + $0x2cc] ss:$16 sps:$4 sm:$0xff]  }
  0x80   :  { %1388 = vmatprep.subr.bf16.mxu1 %v2271_v21  ;;  %v2355_v20 = vld [vmem:[#allocation5 + $0x4cc] ss:$16 sps:$4 sm:$0xff]   ;;  %v2350_v21 = vld [vmem:[#allocation5 + $0x2c8] ss:$16 sps:$4 sm:$0xff]  }
  0x82   :  { %1348 = vmatpush1.bf16.msra.mxu0 %v2266_v22  ;;  %v2353_v22 = vld [vmem:[#allocation5 + $0x4c8] ss:$16 sps:$4 sm:$0xff]  }
  0x83   :  { %1389 = vmatpush1.bf16.msra.mxu1 %v2269_v23  ;;  %1349 = vmatprep.subr.bf16.mxu0 %v2274_v24  ;;  %v2358_v23 = vld [vmem:[#allocation5 + $0x2ac] ss:$16 sps:$4 sm:$0xff]  }
  0x84   :  { %1390 = vmatprep.subr.bf16.mxu1 %v2277_v25  ;;  %v2361_v24 = vld [vmem:[#allocation5 + $0x4ac] ss:$16 sps:$4 sm:$0xff]   ;;  %v2356_v25 = vld [vmem:[#allocation5 + $0x2a8] ss:$16 sps:$4 sm:$0xff]  }
  0x86   :  { %1350 = vmatpush1.bf16.msra.mxu0 %v2272_v26  ;;  %v2359_v26 = vld [vmem:[#allocation5 + $0x4a8] ss:$16 sps:$4 sm:$0xff]  }
  0x87   :  { %1391 = vmatpush1.bf16.msra.mxu1 %v2275_v27  ;;  %1351 = vmatprep.subr.bf16.mxu0 %v2280_v28  ;;  %v2364_v27 = vld [vmem:[#allocation5 + $0x28c] ss:$16 sps:$4 sm:$0xff]  }
  0x88   :  { %1392 = vmatprep.subr.bf16.mxu1 %v2283_v29  ;;  %v2367_v28 = vld [vmem:[#allocation5 + $0x48c] ss:$16 sps:$4 sm:$0xff]   ;;  %v2362_v29 = vld [vmem:[#allocation5 + $0x288] ss:$16 sps:$4 sm:$0xff]  }
  0x8a   :  { %1352 = vmatpush1.bf16.msra.mxu0 %v2278_v30  ;;  %v2370_v30 = vld [vmem:[#allocation5 + $0x26c] ss:$16 sps:$4 sm:$0xff]  }
  0x8b   :  { %1393 = vmatpush1.bf16.msra.mxu1 %v2281_v31  ;;  %1353 = vmatprep.subr.bf16.mxu0 %v2286_v32  ;;  %v2373_v31 = vld [vmem:[#allocation5 + $0x46c] ss:$16 sps:$4 sm:$0xff]   ;;  %v2368_v32 = vld [vmem:[#allocation5 + $0x268] ss:$16 sps:$4 sm:$0xff]  }
  0x8c   :  { %1394 = vmatprep.subr.bf16.mxu1 %v2289_v33  ;;  %v2371_v33 = vld [vmem:[#allocation5 + $0x468] ss:$16 sps:$4 sm:$0xff]  }
  0x8e   :  { %1354 = vmatpush1.bf16.msra.mxu0 %v2284_v36  ;;  %v2377_v36 = vld [vmem:[#allocation5 + $0x448] ss:$16 sps:$4 sm:$0xff]  }
  0x8f   :  { %1395 = vmatpush1.bf16.msra.mxu1 %v2287_v37  ;;  %1355 = vmatprep.subr.bf16.mxu0 %v2292_v38  ;;  %v2382_v37 = vld [vmem:[#allocation5 + $0x22c] ss:$16 sps:$4 sm:$0xff]  }
  0x90   :  { %1396 = vmatprep.subr.bf16.mxu1 %v2295_v39  ;;  %v2385_v38 = vld [vmem:[#allocation5 + $0x42c] ss:$16 sps:$4 sm:$0xff]   ;;  %v2380_v39 = vld [vmem:[#allocation5 + $0x228] ss:$16 sps:$4 sm:$0xff]  }
  0x92   :  { %1356 = vmatpush1.bf16.msra.mxu0 %v2290_v40  ;;  %v2383_v40 = vld [vmem:[#allocation5 + $0x428] ss:$16 sps:$4 sm:$0xff]  }
  0x93   :  { %1397 = vmatpush1.bf16.msra.mxu1 %v2293_v41  ;;  %1357 = vmatprep.subr.bf16.mxu0 %v2298_v42  ;;  %v2388_v41 = vld [vmem:[#allocation5 + $0x20c] ss:$16 sps:$4 sm:$0xff]  }
  0x94   :  { %1398 = vmatprep.subr.bf16.mxu1 %v2301_v43  ;;  %v2391_v42 = vld [vmem:[#allocation5 + $0x40c] ss:$16 sps:$4 sm:$0xff]   ;;  %v2386_v43 = vld [vmem:[#allocation5 + $0x208] ss:$16 sps:$4 sm:$0xff]  }
  0x96   :  { %1358 = vmatpush2.bf16.msra.mxu0 %v2296_v44  ;;  %v2389_v44 = vld [vmem:[#allocation5 + $0x408] ss:$16 sps:$4 sm:$0xff]  }
  0x97   :  { %1399 = vmatpush2.bf16.msra.mxu1 %v2299_v45  ;;  %1359 = vmatprep.subr.bf16.mxu0 %v2304_v46  ;;  %v2394_v45 = vld [vmem:[#allocation5 + $0x3ec] ss:$16 sps:$4 sm:$0xff]  }
  0x98   :  { %1400 = vmatprep.subr.bf16.mxu1 %v2307_v47  ;;  %v2397_v46 = vld [vmem:[#allocation5 + $0x5ec] ss:$16 sps:$4 sm:$0xff]   ;;  %v2392_v47 = vld [vmem:[#allocation5 + $0x3e8] ss:$16 sps:$4 sm:$0xff]  }
  0x9a   :  { %1360 = vmatpush2.bf16.msra.mxu0 %v2302_v48  ;;  %v2395_v48 = vld [vmem:[#allocation5 + $0x5e8] ss:$16 sps:$4 sm:$0xff]  }
  0x9b   :  { %1401 = vmatpush2.bf16.msra.mxu1 %v2305_v49  ;;  %1361 = vmatprep.subr.bf16.mxu0 %v2310_v50  ;;  %v2400_v49 = vld [vmem:[#allocation5 + $0x3cc] ss:$16 sps:$4 sm:$0xff]  }
  0x9c   :  { %1402 = vmatprep.subr.bf16.mxu1 %v2313_v51  ;;  %v2403_v50 = vld [vmem:[#allocation5 + $0x5cc] ss:$16 sps:$4 sm:$0xff]   ;;  %v2398_v51 = vld [vmem:[#allocation5 + $0x3c8] ss:$16 sps:$4 sm:$0xff]  }
  0x9e   :  { %1362 = vmatpush2.bf16.msra.mxu0 %v2308_v53  ;;  %v2401_v53 = vld [vmem:[#allocation5 + $0x5c8] ss:$16 sps:$4 sm:$0xff]  }
  0x9f   :  { %1403 = vmatpush2.bf16.msra.mxu1 %v2311_v54  ;;  %1363 = vmatprep.subr.bf16.mxu0 %v2316_v55  ;;  %v2406_v54 = vld [vmem:[#allocation5 + $0x3ac] ss:$16 sps:$4 sm:$0xff]  }
  0xa0   :  { %1404 = vmatprep.subr.bf16.mxu1 %v2319_v56  ;;  %v2409_v55 = vld [vmem:[#allocation5 + $0x5ac] ss:$16 sps:$4 sm:$0xff]   ;;  %v2404_v56 = vld [vmem:[#allocation5 + $0x3a8] ss:$16 sps:$4 sm:$0xff]  }
  0xa2   :  { %1364 = vmatpush2.bf16.msra.mxu0 %v2314_v57  ;;  %v2407_v57 = vld [vmem:[#allocation5 + $0x5a8] ss:$16 sps:$4 sm:$0xff]  }
  0xa3   :  { %1405 = vmatpush2.bf16.msra.mxu1 %v2317_v58  ;;  %1365 = vmatprep.subr.bf16.mxu0 %v2322_v59  ;;  %v2412_v58 = vld [vmem:[#allocation5 + $0x38c] ss:$16 sps:$4 sm:$0xff]  }
  0xa4   :  { %1406 = vmatprep.subr.bf16.mxu1 %v2325_v60  ;;  %v2415_v59 = vld [vmem:[#allocation5 + $0x58c] ss:$16 sps:$4 sm:$0xff]   ;;  %v2410_v60 = vld [vmem:[#allocation5 + $0x388] ss:$16 sps:$4 sm:$0xff]  }
  0xa6   :  { %1366 = vmatpush2.bf16.msra.mxu0 %v2320_v61  ;;  %v2413_v61 = vld [vmem:[#allocation5 + $0x588] ss:$16 sps:$4 sm:$0xff]  }
  0xa7   :  { %1407 = vmatpush2.bf16.msra.mxu1 %v2323_v62  ;;  %1367 = vmatprep.subr.bf16.mxu0 %v2328_v63  ;;  %v2418_v62 = vld [vmem:[#allocation5 + $0x36c] ss:$16 sps:$4 sm:$0xff]  }
  0xa8   :  { %1408 = vmatprep.subr.bf16.mxu1 %v2331_v0  ;;  %v2421_v63 = vld [vmem:[#allocation5 + $0x56c] ss:$16 sps:$4 sm:$0xff]   ;;  %v2416_v0 = vld [vmem:[#allocation5 + $0x368] ss:$16 sps:$4 sm:$0xff]  }
  0xaa   :  { %1368 = vmatpush2.bf16.msra.mxu0 %v2326_v1  ;;  %v2419_v1 = vld [vmem:[#allocation5 + $0x568] ss:$16 sps:$4 sm:$0xff]  }
  0xab   :  { %1409 = vmatpush2.bf16.msra.mxu1 %v2329_v2  ;;  %1369 = vmatprep.subr.bf16.mxu0 %v2334_v3  ;;  %v2424_v2 = vld [vmem:[#allocation5 + $0x34c] ss:$16 sps:$4 sm:$0xff]  }
  0xac   :  { %1410 = vmatprep.subr.bf16.mxu1 %v2337_v4  ;;  %v2427_v3 = vld [vmem:[#allocation5 + $0x54c] ss:$16 sps:$4 sm:$0xff]   ;;  %v2422_v4 = vld [vmem:[#allocation5 + $0x348] ss:$16 sps:$4 sm:$0xff]  }
  0xae   :  { %1370 = vmatpush2.bf16.msra.mxu0 %v2332_v5  ;;  %v2425_v5 = vld [vmem:[#allocation5 + $0x548] ss:$16 sps:$4 sm:$0xff]  }
  0xaf   :  { %1411 = vmatpush2.bf16.msra.mxu1 %v2335_v6  ;;  %1371 = vmatprep.subr.bf16.mxu0 %v2340_v7  ;;  %v2430_v6 = vld [vmem:[#allocation5 + $0x32c] ss:$16 sps:$4 sm:$0xff]  }
  0xb0   :  { %1412 = vmatprep.subr.bf16.mxu1 %v2343_v10  ;;  %v2433_v7 = vld [vmem:[#allocation5 + $0x52c] ss:$16 sps:$4 sm:$0xff]   ;;  %v2428_v10 = vld [vmem:[#allocation5 + $0x328] ss:$16 sps:$4 sm:$0xff]  }
  0xb2   :  { %1372 = vmatpush2.bf16.msra.mxu0 %v2338_v11  ;;  %v2431_v11 = vld [vmem:[#allocation5 + $0x528] ss:$16 sps:$4 sm:$0xff]  }
  0xb3   :  { %1413 = vmatpush2.bf16.msra.mxu1 %v2341_v12  ;;  %1423 = vmatprep.subr.bf16.mxu0 %v2346_v14  ;;  %v2436_v12 = vld [vmem:[#allocation5 + $0x30c] ss:$16 sps:$4 sm:$0xff]   ;;  %v2434_v14 = vld [vmem:[#allocation5 + $0x308] ss:$16 sps:$4 sm:$0xff]  }
  0xb4   :  { %1464 = vmatprep.subr.bf16.mxu1 %v2349_v15  ;;  %v2437_v15 = vld [vmem:[#allocation5 + $0x508] ss:$16 sps:$4 sm:$0xff]  }
  0xb5   :  { %1374 = vmatmul.mubr.bf16.vlgmr.msra.gmra.mxu0 %v2647_v16 }
  0xb6   :  { %1415 = vmatmul.mubr.bf16.vlgmr.msra.gmra.mxu1 %v2637_v8  ;;  %1424 = vmatpush1.bf16.msra.mxu0 %v2344_v17  ;;  %v2365_v8 = vld [vmem:[#allocation5 + $0x488] ss:$16 sps:$4 sm:$0xff]   ;;  %v2440_v17 = vld [vmem:[#allocation8 + $0x78] sm:$0xff]  }
  0xb7   :  { %1465 = vmatpush1.bf16.msra.mxu1 %v2347_v18  ;;  %1425 = vmatprep.subr.bf16.mxu0 %v2352_v19  ;;  %v2441_v18 = vld [vmem:[#allocation8 + $0x38] sm:$0xff]   ;;  %v2442_v19 = vld [vmem:[#allocation8 + $0x70] sm:$0xff]  }
  0xb8   :  { %1466 = vmatprep.subr.bf16.mxu1 %v2355_v20  ;;  %1455 = vmatprep.mubr.bf16.mxu0 %v2633_v52  ;;  %v2379_v52 = vld [vmem:[#allocation5 + $0x44c] ss:$16 sps:$4 sm:$0xff]   ;;  %v2443_v20 = vld [vmem:[#allocation8 + $0x30] sm:$0xff]  }
  0xb9   :  { %1496 = vmatprep.mubr.bf16.mxu1 %v2644_v35  ;;  %v2374_v35 = vld [vmem:[#allocation5 + $0x248] ss:$16 sps:$4 sm:$0xff]  }
  0xba   :  { %1426 = vmatpush1.bf16.msra.mxu0 %v2350_v21  ;;  %v2444_v21 = vld [vmem:[#allocation8 + $0x68] sm:$0xff]  }
  0xbb   :  { %1467 = vmatpush1.bf16.msra.mxu1 %v2353_v22  ;;  %1427 = vmatprep.subr.bf16.mxu0 %v2358_v23  ;;  %v2445_v22 = vld [vmem:[#allocation8 + $0x28] sm:$0xff]   ;;  %v2446_v23 = vld [vmem:[#allocation8 + $0x60] sm:$0xff]  }
  0xbc   :  { %1468 = vmatprep.subr.bf16.mxu1 %v2361_v24  ;;  %v2447_v24 = vld [vmem:[#allocation8 + $0x20] sm:$0xff]  }
  0xbe   :  { %1428 = vmatpush1.bf16.msra.mxu0 %v2356_v25  ;;  %v2448_v25 = vld [vmem:[#allocation8 + $0x58] sm:$0xff]  }
  0xbf   :  { %1469 = vmatpush1.bf16.msra.mxu1 %v2359_v26  ;;  %1429 = vmatprep.subr.bf16.mxu0 %v2364_v27  ;;  %v2456_v26 = vld [vmem:[#allocation8 + $0xf8] sm:$0xff]  }
  0xc0   :  { %1470 = vmatprep.subr.bf16.mxu1 %v2367_v28  ;;  %v2457_v27 = vld [vmem:[#allocation8 + $0xb8] sm:$0xff]   ;;  %v2458_v28 = vld [vmem:[#allocation8 + $0xf0] sm:$0xff]  }
  0xc2   :  { %1430 = vmatpush1.bf16.msra.mxu0 %v2362_v29  ;;  %v2450_v29 = vld [vmem:[#allocation8 + $0x50] sm:$0xff]  }
  0xc3   :  { %1471 = vmatpush1.bf16.msra.mxu1 %v2365_v8  ;;  %1431 = vmatprep.subr.bf16.mxu0 %v2370_v30  ;;  %v2460_v8 = vld [vmem:[#allocation8 + $0xe8] sm:$0xff]   ;;  %v2451_v30 = vld [vmem:[#allocation8 + $0x10] sm:$0xff]  }
  0xc4   :  { %1472 = vmatprep.subr.bf16.mxu1 %v2373_v31  ;;  %v2461_v31 = vld [vmem:[#allocation8 + $0xa8] sm:$0xff]  }
  0xc6   :  { %1432 = vmatpush1.bf16.msra.mxu0 %v2368_v32  ;;  %v2452_v32 = vld [vmem:[#allocation8 + $0x48] sm:$0xff]  }
  0xc7   :  { %1473 = vmatpush1.bf16.msra.mxu1 %v2371_v33  ;;  %1433 = vmatprep.subr.bf16.mxu0 %v2376_v34  ;;  %v2462_v33 = vld [vmem:[#allocation8 + $0xe0] sm:$0xff]   ;;  %v2453_v34 = vld [vmem:[#allocation8 + $0x8] sm:$0xff]  }
  0xc8   :  { %1474 = vmatprep.subr.bf16.mxu1 %v2379_v52  ;;  %v2463_v52 = vld [vmem:[#allocation8 + $0xa0] sm:$0xff]  }
  0xca   :  { %1434 = vmatpush1.bf16.msra.mxu0 %v2374_v35  ;;  %v2454_v35 = vld [vmem:[#allocation8 + $0x40] sm:$0xff]  }
  0xcb   :  { %1475 = vmatpush1.bf16.msra.mxu1 %v2377_v36  ;;  %1435 = vmatprep.subr.bf16.mxu0 %v2382_v37  ;;  %v2464_v36 = vld [vmem:[#allocation8 + $0xd8] sm:$0xff]   ;;  %v2455_v37 = vld [vmem:[#allocation8] sm:$0xff]  }
  0xcc   :  { %1476 = vmatprep.subr.bf16.mxu1 %v2385_v38  ;;  %v2465_v38 = vld [vmem:[#allocation8 + $0x98] sm:$0xff]  }
  0xce   :  { %1436 = vmatpush1.bf16.msra.mxu0 %v2380_v39  ;;  %v2466_v39 = vld [vmem:[#allocation8 + $0xd0] sm:$0xff]  }
  0xcf   :  { %1477 = vmatpush1.bf16.msra.mxu1 %v2383_v40  ;;  %1437 = vmatprep.subr.bf16.mxu0 %v2388_v41  ;;  %v2467_v40 = vld [vmem:[#allocation8 + $0x90] sm:$0xff]  }
  0xd0   :  { %1478 = vmatprep.subr.bf16.mxu1 %v2391_v42 }
  0xd2   :  { %1438 = vmatpush1.bf16.msra.mxu0 %v2386_v43 }
  0xd3   :  { %1479 = vmatpush1.bf16.msra.mxu1 %v2389_v44  ;;  %1439 = vmatprep.subr.bf16.mxu0 %v2394_v45  ;;  %v2468_v45 = vld [vmem:[#allocation8 + $0xc8] sm:$0xff]  }
  0xd4   :  { %1480 = vmatprep.subr.bf16.mxu1 %v2397_v46  ;;  %v2469_v46 = vld [vmem:[#allocation8 + $0x88] sm:$0xff]  }
  0xd6   :  { %1440 = vmatpush2.bf16.msra.mxu0 %v2392_v47 }
  0xd7   :  { %1481 = vmatpush2.bf16.msra.mxu1 %v2395_v48  ;;  %1441 = vmatprep.subr.bf16.mxu0 %v2400_v49 }
  0xd8   :  { %1482 = vmatprep.subr.bf16.mxu1 %v2403_v50 }
  0xda   :  { %1442 = vmatpush2.bf16.msra.mxu0 %v2398_v51  ;;  %v2470_v51 = vld [vmem:[#allocation8 + $0xc0] sm:$0xff]  }
  0xdb   :  { %1483 = vmatpush2.bf16.msra.mxu1 %v2401_v53  ;;  %1443 = vmatprep.subr.bf16.mxu0 %v2406_v54  ;;  %v2471_v53 = vld [vmem:[#allocation8 + $0x80] sm:$0xff]   ;;  %v279_v54 = vlaneseq }
  0xdc   :  { %1484 = vmatprep.subr.bf16.mxu1 %v2409_v55 }
  0xdd   :  { %v280_v55 = vshrl.u32 %v279_v54, 7 }
  0xde   :  { %1444 = vmatpush2.bf16.msra.mxu0 %v2404_v56 }
  0xdf   :  { %1485 = vmatpush2.bf16.msra.mxu1 %v2407_v57  ;;  %1445 = vmatprep.subr.bf16.mxu0 %v2412_v58  ;;  %v281_v56 = vsub.s32 0, %v280_v55  ;;  %v277_v57 = vld [vmem:[#allocation7] sm:$0xf]  ;;  %v285_v58 = vsub.s32 1, %v280_v55 }
  0xe0   :  { %1486 = vmatprep.subr.bf16.mxu1 %v2415_v59 }
  0xe1   :  { %v282_v59 = vrot.slane %v277_v57, %v281_v56 }
  0xe2   :  { %1446 = vmatpush2.bf16.msra.mxu0 %v2410_v60  ;;  %v286_v60 = vrot.slane %v277_v57, %v285_v58 }
  0xe3   :  { %1487 = vmatpush2.bf16.msra.mxu1 %v2413_v61  ;;  %1447 = vmatprep.subr.bf16.mxu0 %v2418_v62 }
  0xe4   :  { %1488 = vmatprep.subr.bf16.mxu1 %v2421_v63 }
  0xe6   :  { %1448 = vmatpush2.bf16.msra.mxu0 %v2416_v0 }
  0xe7   :  { %1489 = vmatpush2.bf16.msra.mxu1 %v2419_v1  ;;  %1449 = vmatprep.subr.bf16.mxu0 %v2424_v2 }
  0xe8   :  { %1490 = vmatprep.subr.bf16.mxu1 %v2427_v3 }
  0xea   :  { %1450 = vmatpush2.bf16.msra.mxu0 %v2422_v4 }
  0xeb   :  { %1491 = vmatpush2.bf16.msra.mxu1 %v2425_v5  ;;  %1451 = vmatprep.subr.bf16.mxu0 %v2430_v6 }
  0xec   :  { %1492 = vmatprep.subr.bf16.mxu1 %v2433_v7 }
  0xee   :  { %1452 = vmatpush2.bf16.msra.mxu0 %v2428_v10 }
  0xef   :  { %1493 = vmatpush2.bf16.msra.mxu1 %v2431_v11  ;;  %1453 = vmatprep.subr.bf16.mxu0 %v2436_v12 }
  0xf0   :  { %1494 = vmatprep.subr.bf16.mxu1 %v2439_v13 }
  0xf2   :  { %1454 = vmatpush2.bf16.msra.mxu0 %v2434_v14 }
  0xf3   :  { %1495 = vmatpush2.bf16.msra.mxu1 %v2437_v15  ;;  %2099 = vmatprep.subr.bf16.mxu0 %v2440_v17 }
  0xf4   :  { %2121 = vmatprep.subr.bf16.mxu1 %v2456_v26 }
  0xf5   :  { %1456 = vmatmul.mubr.bf16.vlgmr.msra.gmra.mxu0 %v2639_v9  ;;  %v2449_v9 = vld [vmem:[#allocation8 + $0x18] sm:$0xff]  }
  0xf6   :  { %1497 = vmatmul.mubr.bf16.vlgmr.msra.gmra.mxu1 %v2647_v16  ;;  %2100 = vmatpush3.bf16.msra.mxu0 %v2441_v18  ;;  %v2459_v16 = vld [vmem:[#allocation8 + $0xb0] sm:$0xff]   ;;  %v289_v18 = vsub.s32 2, %v280_v55 }
  0xf7   :  { %2101 = vmatprep.subr.bf16.mxu0 %v2442_v19  ;;  %2122 = vmatpush3.bf16.msra.mxu1 %v2457_v27  ;;  %v293_v19 = vsub.s32 3, %v280_v55 }
  0xf8   :  { %2123 = vmatprep.subr.bf16.mxu1 %v2458_v28 }
  0xfa   :  { %2102 = vmatpush3.bf16.msra.mxu0 %v2443_v20  ;;  %v290_v20 = vrot.slane %v277_v57, %v289_v18 }
  0xfb   :  { %2103 = vmatprep.subr.bf16.mxu0 %v2444_v21  ;;  %2124 = vmatpush3.bf16.msra.mxu1 %v2459_v16  ;;  %v294_v21 = vrot.slane %v277_v57, %v293_v19 }
  0xfc   :  { %2125 = vmatprep.subr.bf16.mxu1 %v2460_v8 }
  0xfe   :  { %2104 = vmatpush3.bf16.msra.mxu0 %v2445_v22 }
  0xff   :  { %2105 = vmatprep.subr.bf16.mxu0 %v2446_v23  ;;  %2126 = vmatpush3.bf16.msra.mxu1 %v2461_v31 }
 0x100   :  { %2127 = vmatprep.subr.bf16.mxu1 %v2462_v33 }
 0x102   :  { %2106 = vmatpush3.bf16.msra.mxu0 %v2447_v24 }
 0x103   :  { %2107 = vmatprep.subr.bf16.mxu0 %v2448_v25  ;;  %2128 = vmatpush3.bf16.msra.mxu1 %v2463_v52 }
 0x104   :  { %2129 = vmatprep.subr.bf16.mxu1 %v2464_v36 }
 0x106   :  { %2108 = vmatpush3.bf16.msra.mxu0 %v2449_v9 }
 0x107   :  { %2109 = vmatprep.subr.bf16.mxu0 %v2450_v29  ;;  %2130 = vmatpush3.bf16.msra.mxu1 %v2465_v38 }
 0x108   :  { %2131 = vmatprep.subr.bf16.mxu1 %v2466_v39 }
 0x10a   :  { %2110 = vmatpush3.bf16.msra.mxu0 %v2451_v30 }
 0x10b   :  { %2111 = vmatprep.subr.bf16.mxu0 %v2452_v32  ;;  %2132 = vmatpush3.bf16.msra.mxu1 %v2467_v40 }
 0x10c   :  { %2133 = vmatprep.subr.bf16.mxu1 %v2468_v45 }
 0x10e   :  { %2112 = vmatpush3.bf16.msra.mxu0 %v2453_v34 }
 0x10f   :  { %2113 = vmatprep.subr.bf16.mxu0 %v2454_v35  ;;  %2134 = vmatpush3.bf16.msra.mxu1 %v2469_v46 }
 0x110   :  { %2135 = vmatprep.subr.bf16.mxu1 %v2470_v51 }
 0x112   :  { %2114 = vmatpush3.bf16.msra.mxu0 %v2455_v37 }
 0x113   :  { %2136 = vmatpush3.bf16.msra.mxu1 %v2471_v53 }
 0x135   :  { %v1293_v41 = vpop.f32.mrf.mxu0 }
 0x136   :  { %v1334_v42 = vpop.f32.mrf.mxu1  ;;  %v1294_v61 = vadd.f32 %v1293_v41, %v282_v59  ;;  %v2066_v41 = vld [vmem:[%s2665_s4] ss:$0 sm:$0xff] }
 0x137   :  { %v1295_v43 = vpop.f32.mrf.mxu0 }
 0x138   :  { %v1336_v44 = vpop.f32.mrf.mxu1  ;;  %v1296_v62 = vadd.f32 %v1295_v43, %v286_v60  ;;  %v1335_v63 = vadd.f32 %v1334_v42, %v1294_v61 }
 0x139   :  { %v1297_v47 = vpop.f32.mrf.mxu0 }
 0x13a   :  { %v1338_v48 = vpop.f32.mrf.mxu1  ;;  %v1337_v2 = vadd.f32 %v1336_v44, %v1296_v62 }
 0x13b   :  { %v1298_v49 = vpop.f32.mrf.mxu0 }
 0x13c   :  { %v1339_v50 = vpop.f32.mrf.mxu1 }
 0x175   :  { %v1375_v0 = vpop.f32.mrf.mxu0 }
 0x176   :  { %v1416_v1 = vpop.f32.mrf.mxu1  ;;  %v1376_v3 = vadd.f32 %v1375_v0, %v1335_v63 }
 0x177   :  { %v1377_v4 = vpop.f32.mrf.mxu0  ;;  %v1417_v22 = vadd.f32 %v1416_v1, %v290_v20 }
 0x178   :  { %v1418_v5 = vpop.f32.mrf.mxu1  ;;  %v1378_v6 = vadd.f32 %v1377_v4, %v1337_v2  ;;  %v1505_v7 = vmax.f32 %v1376_v3, 0.0 }
 0x179   :  { %v1379_v10 = vpop.f32.mrf.mxu0  ;;  %v1419_v25 = vadd.f32 %v1418_v5, %v294_v21 }
 0x17a   :  { %v1420_v11 = vpop.f32.mrf.mxu1  ;;  %v1506_v12 = vmax.f32 %v1378_v6, 0.0  ;;  %v1509_v17 = vpack.c.bf16 %v1505_v7, %v1505_v7 }
 0x17b   :  { %v1380_v13 = vpop.f32.mrf.mxu0 }
 0x17c   :  { %v1421_v14 = vpop.f32.mrf.mxu1  ;;  %v1510_v15 = vpack.c.bf16 %v1506_v12, %v1506_v12 }
 0x17e   :  { %1808 = vmatprep.mubr.bf16.mxu0 %v1510_v15 }
 0x17f   :  { %1809 = vmatmul.mubr.bf16.vlgmr.msra.gmra.mxu0 %v1509_v17 }
 0x1b5   :  { %v1457_v23 = vpop.f32.mrf.mxu0 }
 0x1b6   :  { %v1498_v24 = vpop.f32.mrf.mxu1  ;;  %v1458_v26 = vadd.f32 %v1457_v23, %v1417_v22 }
 0x1b7   :  { %v1459_v27 = vpop.f32.mrf.mxu0 }
 0x1b8   :  { %v1500_v28 = vpop.f32.mrf.mxu1  ;;  %v1499_v9 = vadd.f32 %v1498_v24, %v1458_v26  ;;  %v1460_v16 = vadd.f32 %v1459_v27, %v1419_v25 }
 0x1b9   :  { %v1461_v29 = vpop.f32.mrf.mxu0 }
 0x1ba   :  { %v1502_v8 = vpop.f32.mrf.mxu1  ;;  %v1501_v30 = vadd.f32 %v1500_v28, %v1460_v16  ;;  %v1507_v31 = vmax.f32 %v1499_v9, 0.0 }
 0x1bb   :  { %v1462_v32 = vpop.f32.mrf.mxu0 }
 0x1bc   :  { %v1503_v33 = vpop.f32.mrf.mxu1  ;;  %v1508_v34 = vmax.f32 %v1501_v30, 0.0  ;;  %v1511_v35 = vpack.c.bf16 %v1507_v31, %v1507_v31 }
 0x1be   :  { %v1512_v52 = vpack.c.bf16 %v1508_v34, %v1508_v34 }
 0x1c0   :  { %1848 = vmatprep.mubr.bf16.mxu1 %v1512_v52 }
 0x1c1   :  { %1849 = vmatmul.mubr.bf16.vlgmr.msra.gmra.mxu1 %v1511_v35 }
 0x23f   :  { %v2115_v36 = vpop.f32.mrf.mxu0 }
 0x241   :  { %v2116_v37 = vpop.f32.mrf.mxu0 }
 0x242   :  { %v2117_v38 = vadd.f32 %v2116_v37, %v2115_v36 }
 0x243   :  { %v2118_v39 = vpop.f32.mrf.mxu0 }
 0x244   :  { %v1811_v44 = vadd.f32 %v2117_v38, %v2066_v41 }
 0x245   :  { %v2119_v40 = vpop.f32.mrf.mxu0 }
 0x281   :  { %v2137_v42 = vpop.f32.mrf.mxu1 }
 0x283   :  { %v2138_v43 = vpop.f32.mrf.mxu1 }
 0x284   :  { %v2139_v45 = vadd.f32 %v2138_v43, %v2137_v42 }
 0x285   :  { %v2140_v46 = vpop.f32.mrf.mxu1 }
 0x286   :  { %v1851_v47 = vadd.f32 %v2139_v45, %v1811_v44 }
 0x287   :  { %v2141_v48 = vpop.f32.mrf.mxu1 }
 0x288   :  { %1856 = vst [vmem:[#allocation10] sm:$0xff] %v1851_v47 }
 0x289   :  { %2563 = shalt.err (!%p2560_p10)
}
 0x28a   :  { %1866 = dma.vmem_to_hbm [thread:$0]  %s1864_s16, 128, %s2666_s5, [#allocation4]  }
 0x28b   :  { %2578 = dma.done.wait [#allocation4], 128  }
 0x28c   :  { %2579 = vsyncadd [#allocation4], 4294967168 }
 0x28d   :  { %1870 = vsyncpa [#allocation3], 1 }
 0x28e   :  { %1871 = vsyncpa [#allocation6], 1 }
 0x28f   :  { %1872 = vsyncpa [#allocation9], 1 }
 0x290   :  { %1873 = vsyncpa [#allocation4], 1 }

</bundles_post_ra>
